<compile_context>
chip_gen: v7x
topology: tpu7x:2x2x1
jax: 0.10.0
libtpu: 0.0.40
codegen_flags: <defaults>
</compile_context>

<pallas_src>
import functools

import jax
import jax.numpy as jnp
from jax.experimental import pallas as pl
from jax.experimental.pallas import tpu as pltpu


_TILE_ROWS = 512      # 512 rows * 128 lanes * 8 coords * 4 B = 2 MiB slab per tile
_LANES = 128


def _weighted_giou_loss(slab_ref, w_ref, eps):
    """Weighted (1 - GIoU) for one (tile_rows, 128) tile of aligned box pairs."""
    px1 = slab_ref[0]
    py1 = slab_ref[1]
    px2 = slab_ref[2]
    py2 = slab_ref[3]
    tx1 = slab_ref[4]
    ty1 = slab_ref[5]
    tx2 = slab_ref[6]
    ty2 = slab_ref[7]
    w = w_ref[...]

    area1 = (px2 - px1) * (py2 - py1)
    area2 = (tx2 - tx1) * (ty2 - ty1)

    # intersection
    iw = jnp.maximum(jnp.minimum(px2, tx2) - jnp.maximum(px1, tx1), 0.0)
    ih = jnp.maximum(jnp.minimum(py2, ty2) - jnp.maximum(py1, ty1), 0.0)
    overlap = iw * ih
    union = jnp.maximum(area1 + area2 - overlap, eps)

    # smallest enclosing box
    ew = jnp.maximum(jnp.maximum(px2, tx2) - jnp.minimum(px1, tx1), 0.0)
    eh = jnp.maximum(jnp.maximum(py2, ty2) - jnp.minimum(py1, ty1), 0.0)
    enclose = jnp.maximum(ew * eh, eps)

    # ious  = overlap / union
    # gious = ious - (enclose - union) / enclose = ious - 1 + union / enclose
    # loss  = 1 - gious = 2 - ious - union / enclose
    # Divisions -> EUP approx reciprocals (frees VALU bundles).
    inv_union = pl.reciprocal(union, approx=True)
    inv_enclose = pl.reciprocal(enclose, approx=True)
    return (2.0 - overlap * inv_union - union * inv_enclose) * w


def _giou_sum_kernel(slab_ref, w_ref, psum_ref, *, eps, tile_rows):
    loss = _weighted_giou_loss(slab_ref, w_ref, eps)          # (tile_rows, 128)
    # Sublane-group reduction to an (8, 128) partial (pure VPU adds, no
    # cross-lane reduce); the final scalar sum happens in XLA outside.
    psum_ref[...] = jnp.sum(loss.reshape(tile_rows // 8, 8, _LANES), axis=0)


def _giou_elem_kernel(slab_ref, w_ref, loss_ref, *, eps):
    loss_ref[...] = _weighted_giou_loss(slab_ref, w_ref, eps)


@functools.partial(
    jax.jit, static_argnames=("eps", "tile_rows", "rows", "elementwise"))
def _giou_forward(pred, target, w_vec, *, eps, tile_rows, rows, elementwise):
    """Packs inputs into the coordinate-major slab and runs the Pallas kernel."""
    n = pred.shape[0]
    n_pad = rows * _LANES

    boxes = jnp.concatenate(
        [pred.astype(jnp.float32), target.astype(jnp.float32)], axis=-1)  # (n, 8)
    boxes = jnp.pad(boxes, ((0, n_pad - n), (0, 0)))                      # (n_pad, 8)
    slab = boxes.T.reshape(8, rows, _LANES)                               # (8, R, 128)
    w = jnp.pad(w_vec.astype(jnp.float32), (0, n_pad - n)).reshape(rows, _LANES)

    grid = rows // tile_rows
    compiler_params = pltpu.CompilerParams(
        dimension_semantics=("parallel",),
        vmem_limit_bytes=32 * 1024 * 1024,
    )
    in_specs = [
        pl.BlockSpec((8, tile_rows, _LANES), lambda i: (0, i, 0)),
        pl.BlockSpec((tile_rows, _LANES), lambda i: (i, 0)),
    ]

    if elementwise:
        loss = pl.pallas_call(
            functools.partial(_giou_elem_kernel, eps=eps),
            out_shape=jax.ShapeDtypeStruct((rows, _LANES), jnp.float32),
            grid_spec=pltpu.PrefetchScalarGridSpec(
                num_scalar_prefetch=0,
                grid=(grid,),
                in_specs=in_specs,
                out_specs=pl.BlockSpec((tile_rows, _LANES), lambda i: (i, 0)),
            ),
            compiler_params=compiler_params,
        )(slab, w)
        return loss.reshape(-1)[:n]

    psums = pl.pallas_call(
        functools.partial(_giou_sum_kernel, eps=eps, tile_rows=tile_rows),
        out_shape=jax.ShapeDtypeStruct((grid * 8, _LANES), jnp.float32),
        grid_spec=pltpu.PrefetchScalarGridSpec(
            num_scalar_prefetch=0,
            grid=(grid,),
            in_specs=in_specs,
            out_specs=pl.BlockSpec((8, _LANES), lambda i: (i, 0)),
        ),
        compiler_params=compiler_params,
    )(slab, w)
    return jnp.sum(psums)


class GIoULossPallas:
    """JAX/Pallas reimplementation of GIoULoss.forward (aligned GIoU, weighted)."""

    def __init__(self, eps=1e-6, reduction='mean', loss_weight=1.0):
        self.eps = float(eps)
        self.reduction = reduction
        self.loss_weight = loss_weight

    def __call__(self, pred, target, weight=None, avg_factor=None,
                 reduction_override=None):
        assert reduction_override in (None, 'none', 'mean', 'sum')
        reduction = reduction_override if reduction_override else self.reduction

        pred = jnp.asarray(pred, jnp.float32)
        target = jnp.asarray(target, jnp.float32)
        n = pred.shape[0]

        # NOTE: the PyTorch early-exit `if not torch.any(weight > 0): return
        # pred.sum() * 0.0` is value-equivalent to running with all-zero
        # weights (the weighted loss is identically zero), so we skip the
        # host-blocking any() check to stay jit-/pipeline-friendly.
        if weight is not None:
            weight = jnp.asarray(weight, jnp.float32)
            if weight.ndim > 1:
                assert weight.shape == pred.shape
                weight = weight.mean(-1)
            w_vec = weight
        else:
            w_vec = jnp.ones((n,), jnp.float32)

        # Pad the box axis so rows is a multiple of 8 and of the tile size.
        rows_needed = max(1, -(-n // _LANES))
        rows_needed = -(-rows_needed // 8) * 8            # multiple of 8, >= 8
        tile_rows = min(_TILE_ROWS, rows_needed)
        rows = -(-rows_needed // tile_rows) * tile_rows   # multiple of tile_rows

        if reduction == 'none':
            loss = _giou_forward(pred, target, w_vec, eps=self.eps,
                                 tile_rows=tile_rows, rows=rows,
                                 elementwise=True)
            return self.loss_weight * loss

        total = _giou_forward(pred, target, w_vec, eps=self.eps,
                              tile_rows=tile_rows, rows=rows,
                              elementwise=False)
        if reduction == 'sum':
            out = total
        else:  # 'mean'  (weight_reduce_loss semantics)
            if avg_factor is None:
                denom = jnp.float32(n)
            else:
                denom = jnp.asarray(avg_factor, jnp.float32)
            out = total / denom
        return self.loss_weight * out


def _giou_loss_reference(pred, target, eps):
    # pure-JAX reference for the aligned GIoU loss (per element, unweighted)
    area1 = (pred[:, 2] - pred[:, 0]) * (pred[:, 3] - pred[:, 1])
    area2 = (target[:, 2] - target[:, 0]) * (target[:, 3] - target[:, 1])
    lt = jnp.maximum(pred[:, :2], target[:, :2])
    rb = jnp.minimum(pred[:, 2:], target[:, 2:])
    wh = jnp.clip(rb - lt, 0)
    overlap = wh[:, 0] * wh[:, 1]
    union = jnp.maximum(area1 + area2 - overlap, eps)
    ious = overlap / union
    elt = jnp.minimum(pred[:, :2], target[:, :2])
    erb = jnp.maximum(pred[:, 2:], target[:, 2:])
    ewh = jnp.clip(erb - elt, 0)
    enclose = jnp.maximum(ewh[:, 0] * ewh[:, 1], eps)
    gious = ious - (enclose - union) / enclose
    return 1.0 - gious


if __name__ == "__main__":
    key = jax.random.PRNGKey(0)
    k1, k2, k3, k4, k5 = jax.random.split(key, 5)

    N = 8  # number of (aligned) box pairs
    # build valid boxes: x2 > x1, y2 > y1
    p_xy = jax.random.uniform(k1, (N, 2), jnp.float32) * 10.0
    p_wh = jax.random.uniform(k2, (N, 2), jnp.float32) * 5.0 + 0.5
    pred = jnp.concatenate([p_xy, p_xy + p_wh], axis=-1)       # (N, 4)

    t_xy = jax.random.uniform(k3, (N, 2), jnp.float32) * 10.0
    t_wh = jax.random.uniform(k4, (N, 2), jnp.float32) * 5.0 + 0.5
    target = jnp.concatenate([t_xy, t_xy + t_wh], axis=-1)     # (N, 4)

    weight = jax.random.uniform(k5, (N,), jnp.float32)

    loss_mod = GIoULossPallas(eps=1e-6, reduction='mean', loss_weight=1.0)

    out_mean = jax.block_until_ready(loss_mod(pred, target))
    out_none = jax.block_until_ready(
        loss_mod(pred, target, weight=weight, reduction_override='none'))
    out_sum = jax.block_until_ready(
        loss_mod(pred, target, weight=weight, reduction_override='sum'))

    # sanity check against pure-JAX reference (tolerance covers approx recip)
    ref_elem = _giou_loss_reference(pred, target, 1e-6)
    ref_mean = jnp.mean(ref_elem)
    ref_none = ref_elem * weight
    ref_sum = jnp.sum(ref_none)

    assert jnp.allclose(out_mean, ref_mean, atol=5e-3, rtol=5e-3), (out_mean, ref_mean)
    assert jnp.allclose(out_none, ref_none, atol=5e-3, rtol=5e-3), (out_none, ref_none)
    assert jnp.allclose(out_sum, ref_sum, atol=5e-3, rtol=5e-3), (out_sum, ref_sum)

    print("KERNEL_OK")
</pallas_src>

<mosaic_0001>
module attributes {stable_mosaic.version = 11 : i64} {
  func.func @_giou_sum_kernel(%arg0: i32, %arg1: memref<8x8x128xf32, #tpu.memory_space<vmem>>, %arg2: memref<8x128xf32, #tpu.memory_space<vmem>>, %arg3: memref<8x128xf32, #tpu.memory_space<vmem>>) attributes {dimension_semantics = [#tpu.dimension_semantics<parallel>], iteration_bounds = array<i64: 1>, scalar_prefetch = 0 : i64, scratch_operands = 0 : i64, tpu.core_type = #tpu.core_type<tc>, window_params = [{transform_indices = @transform_0, window_bounds = array<i64: 8, 8, 128>}, {transform_indices = @transform_1, window_bounds = array<i64: 8, 128>}, {transform_indices = @transform_2, window_bounds = array<i64: 8, 128>}]} {
    %c0 = arith.constant 0 : index
    %c0_0 = arith.constant 0 : index
    %c0_1 = arith.constant 0 : index
    %0 = vector.load %arg1[%c0, %c0_0, %c0_1] : memref<8x8x128xf32, #tpu.memory_space<vmem>>, vector<1x8x128xf32>
    %1 = vector.shape_cast %0 : vector<1x8x128xf32> to vector<8x128xf32>
    %c1 = arith.constant 1 : index
    %c0_2 = arith.constant 0 : index
    %c0_3 = arith.constant 0 : index
    %2 = vector.load %arg1[%c1, %c0_2, %c0_3] : memref<8x8x128xf32, #tpu.memory_space<vmem>>, vector<1x8x128xf32>
    %3 = vector.shape_cast %2 : vector<1x8x128xf32> to vector<8x128xf32>
    %c2 = arith.constant 2 : index
    %c0_4 = arith.constant 0 : index
    %c0_5 = arith.constant 0 : index
    %4 = vector.load %arg1[%c2, %c0_4, %c0_5] : memref<8x8x128xf32, #tpu.memory_space<vmem>>, vector<1x8x128xf32>
    %5 = vector.shape_cast %4 : vector<1x8x128xf32> to vector<8x128xf32>
    %c3 = arith.constant 3 : index
    %c0_6 = arith.constant 0 : index
    %c0_7 = arith.constant 0 : index
    %6 = vector.load %arg1[%c3, %c0_6, %c0_7] : memref<8x8x128xf32, #tpu.memory_space<vmem>>, vector<1x8x128xf32>
    %7 = vector.shape_cast %6 : vector<1x8x128xf32> to vector<8x128xf32>
    %c4 = arith.constant 4 : index
    %c0_8 = arith.constant 0 : index
    %c0_9 = arith.constant 0 : index
    %8 = vector.load %arg1[%c4, %c0_8, %c0_9] : memref<8x8x128xf32, #tpu.memory_space<vmem>>, vector<1x8x128xf32>
    %9 = vector.shape_cast %8 : vector<1x8x128xf32> to vector<8x128xf32>
    %c5 = arith.constant 5 : index
    %c0_10 = arith.constant 0 : index
    %c0_11 = arith.constant 0 : index
    %10 = vector.load %arg1[%c5, %c0_10, %c0_11] : memref<8x8x128xf32, #tpu.memory_space<vmem>>, vector<1x8x128xf32>
    %11 = vector.shape_cast %10 : vector<1x8x128xf32> to vector<8x128xf32>
    %c6 = arith.constant 6 : index
    %c0_12 = arith.constant 0 : index
    %c0_13 = arith.constant 0 : index
    %12 = vector.load %arg1[%c6, %c0_12, %c0_13] : memref<8x8x128xf32, #tpu.memory_space<vmem>>, vector<1x8x128xf32>
    %13 = vector.shape_cast %12 : vector<1x8x128xf32> to vector<8x128xf32>
    %c7 = arith.constant 7 : index
    %c0_14 = arith.constant 0 : index
    %c0_15 = arith.constant 0 : index
    %14 = vector.load %arg1[%c7, %c0_14, %c0_15] : memref<8x8x128xf32, #tpu.memory_space<vmem>>, vector<1x8x128xf32>
    %15 = vector.shape_cast %14 : vector<1x8x128xf32> to vector<8x128xf32>
    %c0_16 = arith.constant 0 : index
    %c0_17 = arith.constant 0 : index
    %16 = vector.load %arg2[%c0_16, %c0_17] : memref<8x128xf32, #tpu.memory_space<vmem>>, vector<8x128xf32>
    %17 = arith.subf %5, %1 : vector<8x128xf32>
    %18 = arith.subf %7, %3 : vector<8x128xf32>
    %19 = arith.mulf %17, %18 : vector<8x128xf32>
    %20 = arith.subf %13, %9 : vector<8x128xf32>
    %21 = arith.subf %15, %11 : vector<8x128xf32>
    %22 = arith.mulf %20, %21 : vector<8x128xf32>
    %23 = arith.minimumf %5, %13 : vector<8x128xf32>
    %24 = arith.maximumf %1, %9 : vector<8x128xf32>
    %25 = arith.subf %23, %24 : vector<8x128xf32>
    %cst = arith.constant 0.000000e+00 : f32
    %26 = vector.broadcast %cst : f32 to vector<8x128xf32>
    %27 = arith.maximumf %25, %26 : vector<8x128xf32>
    %28 = arith.minimumf %7, %15 : vector<8x128xf32>
    %29 = arith.maximumf %3, %11 : vector<8x128xf32>
    %30 = arith.subf %28, %29 : vector<8x128xf32>
    %cst_18 = arith.constant 0.000000e+00 : f32
    %31 = vector.broadcast %cst_18 : f32 to vector<8x128xf32>
    %32 = arith.maximumf %30, %31 : vector<8x128xf32>
    %33 = arith.mulf %27, %32 : vector<8x128xf32>
    %34 = arith.addf %19, %22 : vector<8x128xf32>
    %35 = arith.subf %34, %33 : vector<8x128xf32>
    %cst_19 = arith.constant 9.99999997E-7 : f32
    %36 = vector.broadcast %cst_19 : f32 to vector<8x128xf32>
    %37 = arith.maximumf %35, %36 : vector<8x128xf32>
    %38 = arith.maximumf %5, %13 : vector<8x128xf32>
    %39 = arith.minimumf %1, %9 : vector<8x128xf32>
    %40 = arith.subf %38, %39 : vector<8x128xf32>
    %cst_20 = arith.constant 0.000000e+00 : f32
    %41 = vector.broadcast %cst_20 : f32 to vector<8x128xf32>
    %42 = arith.maximumf %40, %41 : vector<8x128xf32>
    %43 = arith.maximumf %7, %15 : vector<8x128xf32>
    %44 = arith.minimumf %3, %11 : vector<8x128xf32>
    %45 = arith.subf %43, %44 : vector<8x128xf32>
    %cst_21 = arith.constant 0.000000e+00 : f32
    %46 = vector.broadcast %cst_21 : f32 to vector<8x128xf32>
    %47 = arith.maximumf %45, %46 : vector<8x128xf32>
    %48 = arith.mulf %42, %47 : vector<8x128xf32>
    %cst_22 = arith.constant 9.99999997E-7 : f32
    %49 = vector.broadcast %cst_22 : f32 to vector<8x128xf32>
    %50 = arith.maximumf %48, %49 : vector<8x128xf32>
    %51 = tpu.reciprocal %37 {approx = true} : vector<8x128xf32> -> vector<8x128xf32>
    %52 = tpu.reciprocal %50 {approx = true} : vector<8x128xf32> -> vector<8x128xf32>
    %53 = arith.mulf %33, %51 : vector<8x128xf32>
    %cst_23 = arith.constant 2.000000e+00 : f32
    %54 = vector.broadcast %cst_23 : f32 to vector<8x128xf32>
    %55 = arith.subf %54, %53 : vector<8x128xf32>
    %56 = arith.mulf %37, %52 : vector<8x128xf32>
    %57 = arith.subf %55, %56 : vector<8x128xf32>
    %58 = arith.mulf %57, %16 : vector<8x128xf32>
    %59 = vector.shape_cast %58 : vector<8x128xf32> to vector<1x8x128xf32>
    %cst_24 = arith.constant dense<0.000000e+00> : vector<8x128xf32>
    %60 = vector.multi_reduction <add>, %59, %cst_24 [0] : vector<1x8x128xf32> to vector<8x128xf32>
    %c0_25 = arith.constant 0 : index
    %c0_26 = arith.constant 0 : index
    %61 = vector.load %arg3[%c0_25, %c0_26] : memref<8x128xf32, #tpu.memory_space<vmem>>, vector<8x128xf32>
    tpu.vector_store %arg3[%c0_25, %c0_26], %60 {strides = array<i32>} : memref<8x128xf32, #tpu.memory_space<vmem>>, vector<8x128xf32>,
    return
  }
  func.func @transform_0(%arg0: i32) -> (i32, i32, i32) {
    %c0_i32 = arith.constant 0 : i32
    %c0_i32_0 = arith.constant 0 : i32
    %c0_i32_1 = arith.constant 0 : i32
    return %c0_i32, %arg0, %c0_i32_0 : i32, i32, i32
  }
  func.func @transform_1(%arg0: i32) -> (i32, i32) {
    %c0_i32 = arith.constant 0 : i32
    %c0_i32_0 = arith.constant 0 : i32
    return %arg0, %c0_i32 : i32, i32
  }
  func.func @transform_2(%arg0: i32) -> (i32, i32) {
    %c0_i32 = arith.constant 0 : i32
    %c0_i32_0 = arith.constant 0 : i32
    return %arg0, %c0_i32 : i32, i32
  }
}

</mosaic_0001>

<bundles_post_ra>
// kernel: _giou_forward.1
= control target key start
LH: loop header
LB: loop body
LE: loop exit
PB: predicated region body
PF: predicated region fallthrough
CT: control target
= control target key end

     0   :  { %s124_s0 = inlined_call_operand.vmem [shape: f32[8,8,128], index: 0, kind: input, shape index: {}]   ;;  %s125_s1 = inlined_call_operand.vmem [shape: f32[8,128], index: 1, kind: input, shape index: {}]   ;;  %s126_s2 = inlined_call_operand.vmem [shape: f32[8,128], index: 2, kind: output, shape index: {}]  }
   0x1   :  { %v11_v0 = vld [vmem:[%s124_s0] sm:$0xff]  ;;  %v68_v1 = vld [vmem:[%s124_s0 + $0x8] sm:$0xff]  ;;  %v69_v2 = vld [vmem:[%s124_s0 + $0x10] sm:$0xff] }
   0x2   :  { %v70_v3 = vld [vmem:[%s124_s0 + $0x18] sm:$0xff]  ;;  %v71_v4 = vld [vmem:[%s124_s0 + $0x20] sm:$0xff]  ;;  %v72_v5 = vld [vmem:[%s124_s0 + $0x28] sm:$0xff]  ;;  %v27_v6 = vsub.f32 %v69_v2, %v11_v0 }
   0x3   :  { %v73_v7 = vld [vmem:[%s124_s0 + $0x30] sm:$0xff]  ;;  %v74_v8 = vld [vmem:[%s124_s0 + $0x38] sm:$0xff]  ;;  %v28_v9 = vsub.f32 %v70_v3, %v68_v1  ;;  %v34_v10 = vmax.f32 %v11_v0, %v71_v4  ;;  %v38_v11 = vmax.f32 %v68_v1, %v72_v5  ;;  %v46_v12 = vmin.f32 %v11_v0, %v71_v4  ;;  %v26_v41 = vld [vmem:[%s125_s1] sm:$0xff] }
   0x4   :  { %v30_v13 = vsub.f32 %v73_v7, %v71_v4  ;;  %v31_v14 = vsub.f32 %v74_v8, %v72_v5  ;;  %v33_v15 = vmin.f32 %v69_v2, %v73_v7  ;;  %v37_v16 = vmin.f32 %v70_v3, %v74_v8 }
   0x5   :  { %v29_v17 = vmul.f32 %v28_v9, %v27_v6  ;;  %v45_v18 = vmax.f32 %v69_v2, %v73_v7  ;;  %v49_v19 = vmax.f32 %v70_v3, %v74_v8  ;;  %v50_v20 = vmin.f32 %v68_v1, %v72_v5 }
   0x6   :  { %v32_v21 = vmul.f32 %v31_v14, %v30_v13  ;;  %v35_v22 = vsub.f32 %v33_v15, %v34_v10  ;;  %v39_v23 = vsub.f32 %v37_v16, %v38_v11 }
   0x7   :  { %v47_v24 = vsub.f32 %v45_v18, %v46_v12  ;;  %v51_v25 = vsub.f32 %v49_v19, %v50_v20 }
   0x8   :  { %v36_v26 = vmax.f32 %v35_v22, 0.0  ;;  %v40_v27 = vmax.f32 %v39_v23, 0.0  ;;  %v42_v28 = vadd.f32 %v32_v21, %v29_v17 }
   0x9   :  { %v48_v29 = vmax.f32 %v47_v24, 0.0  ;;  %v52_v30 = vmax.f32 %v51_v25, 0.0 }
   0xa   :  { %v41_v31 = vmul.f32 %v40_v27, %v36_v26 }
   0xb   :  { %v53_v32 = vmul.f32 %v52_v30, %v48_v29 }
   0xc   :  { %v43_v33 = vsub.f32 %v42_v28, %v41_v31 }
   0xd   :  { %v54_v34 = vmax.f32 %v53_v32, 1e-06 }
   0xe   :  { %v44_v35 = vmax.f32 %v43_v33, 1e-06 }
   0xf   :  { %75 = vrcp.f32 %v54_v34 }
  0x10   :  { %77 = vrcp.f32 %v44_v35 }
  0x19   :  { %v76_v36 = vpop.eup %75 }
  0x1a   :  { %v78_v37 = vpop.eup %77  ;;  %v59_v39 = vmul.f32 %v76_v36, %v44_v35 }
  0x1b   :  { %v57_v38 = vmul.f32 %v78_v37, %v41_v31 }
  0x1d   :  { %v58_v40 = vsub.f32 2.0, %v57_v38 }
  0x1f   :  { %v60_v42 = vsub.f32 %v58_v40, %v59_v39 }
  0x21   :  { %v61_v43 = vmul.f32 %v60_v42, %v26_v41 }
  0x23   :  { %63 = vst [vmem:[%s126_s2] sm:$0xff] %v61_v43 }

</bundles_post_ra>
